<compile_context>
chip_gen: v6e
topology: v6e:2x2x1
jax: 0.10.0
libtpu: 0.0.40
codegen_flags: <defaults>
</compile_context>

<pallas_src>
import functools

import jax
import jax.numpy as jnp
from jax.experimental import pallas as pl
from jax.experimental.pallas import tpu as pltpu

IN_FEATURES = 28 * 28      # 784, forced by x.view(-1, 28*28)
HIDDEN = 100
N_CLASSES = 10

# Lane-padded (multiple-of-128) feature dims.
IN_PAD = 896               # 7 * 128
HID_PAD = 128
OUT_PAD = 128

MAX_TILE_B = 512           # batch tile: x tile ~1.8 MB f32, well under VMEM


def _round_up(x, m):
    return (x + m - 1) // m * m


def _silu_f32(v):
    return v * jax.nn.sigmoid(v)


def _net_kernel(x_ref, w1_ref, b1_ref, w2_ref, b2_ref, w3_ref, b3_ref, o_ref):
    """One batch tile of the whole forward pass (weights resident in VMEM)."""
    x = x_ref[...]                                            # [TB, IN_PAD] f32

    # --- HybridLinearKAN(784 -> 100), fused: [x, silu(x)] @ [W1b; W1k] + b1 ---
    lhs1 = jnp.concatenate([x, _silu_f32(x)], axis=-1).astype(jnp.bfloat16)
    h = (jnp.dot(lhs1, w1_ref[...], preferred_element_type=jnp.float32)
         + b1_ref[...])
    h = jnp.maximum(h, 0.0)                                   # F.relu

    # --- Linear(100 -> 100) ---
    h = (jnp.dot(h.astype(jnp.bfloat16), w2_ref[...],
                 preferred_element_type=jnp.float32) + b2_ref[...])
    h = jnp.maximum(h, 0.0)                                   # F.relu

    # --- HybridLinearKAN(100 -> n_classes), fused ---
    lhs3 = jnp.concatenate([h, _silu_f32(h)], axis=-1).astype(jnp.bfloat16)
    out = (jnp.dot(lhs3, w3_ref[...], preferred_element_type=jnp.float32)
           + b3_ref[...])

    o_ref[...] = out.astype(o_ref.dtype)


@jax.jit
def net_forward(x, prepared):
    """x: any shape reshapable to [-1, 784] (e.g. NCHW [B,1,28,28])."""
    (w1, b1, w2, b2, w3, b3) = prepared

    x2d = x.reshape(-1, IN_FEATURES).astype(jnp.float32)
    batch = x2d.shape[0]

    tile_b = min(MAX_TILE_B, _round_up(batch, 8))
    batch_pad = _round_up(batch, tile_b)
    x_pad = jnp.pad(x2d, ((0, batch_pad - batch), (0, IN_PAD - IN_FEATURES)))
    grid = (batch_pad // tile_b,)

    flops = 2 * batch_pad * (2 * IN_PAD * HID_PAD + HID_PAD * HID_PAD
                             + 2 * HID_PAD * OUT_PAD)
    bytes_accessed = (x_pad.size * 4 + batch_pad * OUT_PAD * 4
                      + sum(int(p.size) * p.dtype.itemsize for p in prepared))
    cost = pl.CostEstimate(flops=flops,
                           transcendentals=batch_pad * (IN_PAD + HID_PAD),
                           bytes_accessed=bytes_accessed)

    resident = lambda i: (0, 0)   # weights/biases: same block every grid step
    out = pl.pallas_call(
        _net_kernel,
        out_shape=jax.ShapeDtypeStruct((batch_pad, OUT_PAD), jnp.float32),
        grid=grid,
        in_specs=[
            pl.BlockSpec((tile_b, IN_PAD), lambda i: (i, 0)),       # x tile
            pl.BlockSpec((2 * IN_PAD, HID_PAD), resident),          # W1 (bf16)
            pl.BlockSpec((1, HID_PAD), resident),                   # b1 (f32)
            pl.BlockSpec((HID_PAD, HID_PAD), resident),             # W2 (bf16)
            pl.BlockSpec((1, HID_PAD), resident),                   # b2 (f32)
            pl.BlockSpec((2 * HID_PAD, OUT_PAD), resident),         # W3 (bf16)
            pl.BlockSpec((1, OUT_PAD), resident),                   # b3 (f32)
        ],
        out_specs=pl.BlockSpec((tile_b, OUT_PAD), lambda i: (i, 0)),
        compiler_params=pltpu.CompilerParams(
            dimension_semantics=("parallel",),
            vmem_limit_bytes=32 * 1024 * 1024),
        cost_estimate=cost,
    )(x_pad, w1, b1, w2, b2, w3, b3)

    return out[:batch, :N_CLASSES]


def init_params(key):
    """PyTorch-Linear-style uniform init; weights stored [in, out]."""
    ks = jax.random.split(key, 8)

    def lin(k, fan_in, fan_out):
        bound = 1.0 / jnp.sqrt(jnp.float32(fan_in))
        return jax.random.uniform(k, (fan_in, fan_out), jnp.float32,
                                  minval=-bound, maxval=bound)

    def bias(k, fan_in, fan_out):
        bound = 1.0 / jnp.sqrt(jnp.float32(fan_in))
        return jax.random.uniform(k, (1, fan_out), jnp.float32,
                                  minval=-bound, maxval=bound)

    w1b = lin(ks[0], IN_FEATURES, HIDDEN)
    w1k = lin(ks[1], IN_FEATURES, HIDDEN)
    b1 = bias(ks[2], IN_FEATURES, HIDDEN)
    w2 = lin(ks[3], HIDDEN, HIDDEN)
    b2 = bias(ks[4], HIDDEN, HIDDEN)
    w3b = lin(ks[5], HIDDEN, N_CLASSES)
    w3k = lin(ks[6], HIDDEN, N_CLASSES)
    b3 = bias(ks[7], HIDDEN, N_CLASSES)
    return (w1b, w1k, b1, w2, b2, w3b, w3k, b3)


def prepare_params(params):
    """Zero-pad to lane multiples, concat KAN weight pairs along K, cast bf16."""
    (w1b, w1k, b1, w2, b2, w3b, w3k, b3) = params

    def pad2(a, rows, cols):
        return jnp.pad(a, ((0, rows - a.shape[0]), (0, cols - a.shape[1])))

    w1 = jnp.concatenate([pad2(w1b, IN_PAD, HID_PAD),
                          pad2(w1k, IN_PAD, HID_PAD)], axis=0).astype(jnp.bfloat16)
    b1p = pad2(b1, 1, HID_PAD)
    w2p = pad2(w2, HID_PAD, HID_PAD).astype(jnp.bfloat16)
    b2p = pad2(b2, 1, HID_PAD)
    w3 = jnp.concatenate([pad2(w3b, HID_PAD, OUT_PAD),
                          pad2(w3k, HID_PAD, OUT_PAD)], axis=0).astype(jnp.bfloat16)
    b3p = pad2(b3, 1, OUT_PAD)
    return (w1, b1p, w2p, b2p, w3, b3p)


def _reference_forward(x, params):
    """Pure-JAX reference of the same math (bf16 matmuls, f32 accumulate)."""
    (w1b, w1k, b1, w2, b2, w3b, w3k, b3) = params
    x2d = x.reshape(-1, IN_FEATURES).astype(jnp.float32)

    def mm(a, w):
        return jax.lax.dot(a.astype(jnp.bfloat16), w.astype(jnp.bfloat16),
                           preferred_element_type=jnp.float32)

    silu = lambda v: v * jax.nn.sigmoid(v)
    h = mm(x2d, w1b) + mm(silu(x2d), w1k) + b1
    h = jnp.maximum(h, 0.0)
    h = mm(h, w2) + b2
    h = jnp.maximum(h, 0.0)
    return mm(h, w3b) + mm(silu(h), w3k) + b3


if __name__ == "__main__":
    key = jax.random.PRNGKey(0)
    k_params, k_x = jax.random.split(key)

    params = init_params(k_params)
    prepared = prepare_params(params)

    # MNIST-like NCHW input, small batch
    x = jax.random.normal(k_x, (2, 1, 28, 28), jnp.float32)

    out = jax.block_until_ready(net_forward(x, prepared))
    ref = _reference_forward(x, params)

    assert out.shape == (2, N_CLASSES)
    assert jnp.allclose(out, ref, atol=5e-2, rtol=5e-2), (
        float(jnp.max(jnp.abs(out - ref))))

    print("KERNEL_OK")
</pallas_src>

<mosaic_0001>
module attributes {stable_mosaic.version = 11 : i64} {
  func.func @_net_kernel(%arg0: i32, %arg1: memref<8x896xf32, #tpu.memory_space<vmem>>, %arg2: memref<1792x128xbf16, #tpu.memory_space<vmem>>, %arg3: memref<1x128xf32, #tpu.memory_space<vmem>>, %arg4: memref<128x128xbf16, #tpu.memory_space<vmem>>, %arg5: memref<1x128xf32, #tpu.memory_space<vmem>>, %arg6: memref<256x128xbf16, #tpu.memory_space<vmem>>, %arg7: memref<1x128xf32, #tpu.memory_space<vmem>>, %arg8: memref<8x128xf32, #tpu.memory_space<vmem>>) attributes {dimension_semantics = [#tpu.dimension_semantics<parallel>], iteration_bounds = array<i64: 1>, scalar_prefetch = 0 : i64, scratch_operands = 0 : i64, tpu.core_type = #tpu.core_type<tc>, window_params = [{transform_indices = @transform_0, window_bounds = array<i64: 8, 896>}, {pipeline_mode = #tpu.pipeline_mode<synchronous>, transform_indices = @transform_1, window_bounds = array<i64: 1792, 128>}, {pipeline_mode = #tpu.pipeline_mode<synchronous>, transform_indices = @transform_2, window_bounds = array<i64: 1, 128>}, {pipeline_mode = #tpu.pipeline_mode<synchronous>, transform_indices = @transform_3, window_bounds = array<i64: 128, 128>}, {pipeline_mode = #tpu.pipeline_mode<synchronous>, transform_indices = @transform_4, window_bounds = array<i64: 1, 128>}, {pipeline_mode = #tpu.pipeline_mode<synchronous>, transform_indices = @transform_5, window_bounds = array<i64: 256, 128>}, {pipeline_mode = #tpu.pipeline_mode<synchronous>, transform_indices = @transform_6, window_bounds = array<i64: 1, 128>}, {transform_indices = @transform_7, window_bounds = array<i64: 8, 128>}]} {
    %c0 = arith.constant 0 : index
    %c0_0 = arith.constant 0 : index
    %0 = vector.load %arg1[%c0, %c0_0] : memref<8x896xf32, #tpu.memory_space<vmem>>, vector<8x896xf32>
    %1 = arith.negf %0 : vector<8x896xf32>
    %2 = math.exp %1 : vector<8x896xf32>
    %cst = arith.constant 1.000000e+00 : f32
    %3 = vector.broadcast %cst : f32 to vector<8x896xf32>
    %4 = arith.addf %3, %2 : vector<8x896xf32>
    %5 = arith.divf %3, %4 : vector<8x896xf32>
    %6 = arith.mulf %0, %5 : vector<8x896xf32>
    %7 = tpu.concatenate %0, %6 in 1 : vector<8x896xf32>, vector<8x896xf32> -> vector<8x1792xf32>
    %8 = arith.truncf %7 : vector<8x1792xf32> to vector<8x1792xbf16>
    %c0_1 = arith.constant 0 : index
    %c0_2 = arith.constant 0 : index
    %9 = vector.load %arg2[%c0_1, %c0_2] : memref<1792x128xbf16, #tpu.memory_space<vmem>>, vector<1792x128xbf16>
    %cst_3 = arith.constant dense<0.000000e+00> : vector<8x128xf32>
    %10 = tpu.matmul %8, %9, %cst_3 {dimension_numbers = #tpu.dot_dimension_numbers<[1], [0], [0], [1], [0, 0, 1, 1], [], []>} : vector<8x1792xbf16>, vector<1792x128xbf16>, vector<8x128xf32> -> vector<8x128xf32>
    %c0_4 = arith.constant 0 : index
    %c0_5 = arith.constant 0 : index
    %11 = vector.load %arg3[%c0_4, %c0_5] : memref<1x128xf32, #tpu.memory_space<vmem>>, vector<1x128xf32>
    %12 = vector.broadcast %11 : vector<1x128xf32> to vector<8x128xf32>
    %13 = arith.addf %10, %12 : vector<8x128xf32>
    %cst_6 = arith.constant 0.000000e+00 : f32
    %14 = vector.broadcast %cst_6 : f32 to vector<8x128xf32>
    %15 = arith.maximumf %13, %14 : vector<8x128xf32>
    %16 = arith.truncf %15 : vector<8x128xf32> to vector<8x128xbf16>
    %c0_7 = arith.constant 0 : index
    %c0_8 = arith.constant 0 : index
    %17 = vector.load %arg4[%c0_7, %c0_8] : memref<128x128xbf16, #tpu.memory_space<vmem>>, vector<128x128xbf16>
    %cst_9 = arith.constant dense<0.000000e+00> : vector<8x128xf32>
    %18 = tpu.matmul %16, %17, %cst_9 {dimension_numbers = #tpu.dot_dimension_numbers<[1], [0], [0], [1], [0, 0, 1, 1], [], []>} : vector<8x128xbf16>, vector<128x128xbf16>, vector<8x128xf32> -> vector<8x128xf32>
    %c0_10 = arith.constant 0 : index
    %c0_11 = arith.constant 0 : index
    %19 = vector.load %arg5[%c0_10, %c0_11] : memref<1x128xf32, #tpu.memory_space<vmem>>, vector<1x128xf32>
    %20 = vector.broadcast %19 : vector<1x128xf32> to vector<8x128xf32>
    %21 = arith.addf %18, %20 : vector<8x128xf32>
    %cst_12 = arith.constant 0.000000e+00 : f32
    %22 = vector.broadcast %cst_12 : f32 to vector<8x128xf32>
    %23 = arith.maximumf %21, %22 : vector<8x128xf32>
    %24 = arith.negf %23 : vector<8x128xf32>
    %25 = math.exp %24 : vector<8x128xf32>
    %cst_13 = arith.constant 1.000000e+00 : f32
    %26 = vector.broadcast %cst_13 : f32 to vector<8x128xf32>
    %27 = arith.addf %26, %25 : vector<8x128xf32>
    %28 = arith.divf %26, %27 : vector<8x128xf32>
    %29 = arith.mulf %23, %28 : vector<8x128xf32>
    %30 = tpu.concatenate %23, %29 in 1 : vector<8x128xf32>, vector<8x128xf32> -> vector<8x256xf32>
    %31 = arith.truncf %30 : vector<8x256xf32> to vector<8x256xbf16>
    %c0_14 = arith.constant 0 : index
    %c0_15 = arith.constant 0 : index
    %32 = vector.load %arg6[%c0_14, %c0_15] : memref<256x128xbf16, #tpu.memory_space<vmem>>, vector<256x128xbf16>
    %cst_16 = arith.constant dense<0.000000e+00> : vector<8x128xf32>
    %33 = tpu.matmul %31, %32, %cst_16 {dimension_numbers = #tpu.dot_dimension_numbers<[1], [0], [0], [1], [0, 0, 1, 1], [], []>} : vector<8x256xbf16>, vector<256x128xbf16>, vector<8x128xf32> -> vector<8x128xf32>
    %c0_17 = arith.constant 0 : index
    %c0_18 = arith.constant 0 : index
    %34 = vector.load %arg7[%c0_17, %c0_18] : memref<1x128xf32, #tpu.memory_space<vmem>>, vector<1x128xf32>
    %35 = vector.broadcast %34 : vector<1x128xf32> to vector<8x128xf32>
    %36 = arith.addf %33, %35 : vector<8x128xf32>
    %c0_19 = arith.constant 0 : index
    %c0_20 = arith.constant 0 : index
    %37 = vector.load %arg8[%c0_19, %c0_20] : memref<8x128xf32, #tpu.memory_space<vmem>>, vector<8x128xf32>
    tpu.vector_store %arg8[%c0_19, %c0_20], %36 {strides = array<i32>} : memref<8x128xf32, #tpu.memory_space<vmem>>, vector<8x128xf32>,
    return
  }
  func.func @transform_0(%arg0: i32) -> (i32, i32) {
    %c0_i32 = arith.constant 0 : i32
    %c0_i32_0 = arith.constant 0 : i32
    return %arg0, %c0_i32 : i32, i32
  }
  func.func @transform_1(%arg0: i32) -> (i32, i32) {
    %c0_i32 = arith.constant 0 : i32
    %c0_i32_0 = arith.constant 0 : i32
    %c0_i32_1 = arith.constant 0 : i32
    return %c0_i32, %c0_i32_0 : i32, i32
  }
  func.func @transform_2(%arg0: i32) -> (i32, i32) {
    %c0_i32 = arith.constant 0 : i32
    %c0_i32_0 = arith.constant 0 : i32
    %c0_i32_1 = arith.constant 0 : i32
    return %c0_i32, %c0_i32_0 : i32, i32
  }
  func.func @transform_3(%arg0: i32) -> (i32, i32) {
    %c0_i32 = arith.constant 0 : i32
    %c0_i32_0 = arith.constant 0 : i32
    %c0_i32_1 = arith.constant 0 : i32
    return %c0_i32, %c0_i32_0 : i32, i32
  }
  func.func @transform_4(%arg0: i32) -> (i32, i32) {
    %c0_i32 = arith.constant 0 : i32
    %c0_i32_0 = arith.constant 0 : i32
    %c0_i32_1 = arith.constant 0 : i32
    return %c0_i32, %c0_i32_0 : i32, i32
  }
  func.func @transform_5(%arg0: i32) -> (i32, i32) {
    %c0_i32 = arith.constant 0 : i32
    %c0_i32_0 = arith.constant 0 : i32
    %c0_i32_1 = arith.constant 0 : i32
    return %c0_i32, %c0_i32_0 : i32, i32
  }
  func.func @transform_6(%arg0: i32) -> (i32, i32) {
    %c0_i32 = arith.constant 0 : i32
    %c0_i32_0 = arith.constant 0 : i32
    %c0_i32_1 = arith.constant 0 : i32
    return %c0_i32, %c0_i32_0 : i32, i32
  }
  func.func @transform_7(%arg0: i32) -> (i32, i32) {
    %c0_i32 = arith.constant 0 : i32
    %c0_i32_0 = arith.constant 0 : i32
    return %arg0, %c0_i32 : i32, i32
  }
}

</mosaic_0001>

<bundles_post_ra>
// kernel: net_forward.1
= control target key start
LH: loop header
LB: loop body
LE: loop exit
PB: predicated region body
PF: predicated region fallthrough
CT: control target
= control target key end

     0   :  { %12 = vsyncpa [#allocation3], 0  ;;  %s2145_s24 = smov [#allocation2]   ;;  %s2346_s0 = inlined_call_operand.vmem [shape: f32[8,896], index: 0, kind: input, shape index: {}]   ;;  %s2347_s1 = inlined_call_operand.hbm [shape: bf16[1792,128], index: 1, kind: input, shape index: {}]   ;;  %s2348_s2 = inlined_call_operand.vmem [shape: f32[1,128], index: 2, kind: input, shape index: {}]   ;;  %s2349_s3 = inlined_call_operand.vmem [shape: bf16[128,128], index: 3, kind: input, shape index: {}]   ;;  %s2350_s4 = inlined_call_operand.vmem [shape: f32[1,128], index: 4, kind: input, shape index: {}]   ;;  %s2351_s5 = inlined_call_operand.vmem [shape: bf16[256,128], index: 5, kind: input, shape index: {}]   ;;  %s2352_s6 = inlined_call_operand.vmem [shape: f32[1,128], index: 6, kind: input, shape index: {}]   ;;  %s2353_s7 = inlined_call_operand.vmem [shape: f32[8,128], index: 7, kind: output, shape index: {}]  }
   0x1   :  { %s20_s25 = sshll.u32 %s2145_s24, 4  ;;  %s21_s25 = int_to_ptr.vmem [resolvable:$true] %s20_s25 }
   0x2   :  { %s2131_s26 = scalar_lea.vmem %s21_s25, 14336  ;;  %p2136_p1 = scmp.lt.s32.totalorder %s21_s25, %s21_s25 }
   0x3   :  { %p2132_p0 = scmp.ne.s32.totalorder %s21_s25, %s2131_s26  ;;  %p2137_p2 = scmp.lt.s32.totalorder %s2131_s26, %s2131_s26 }
   0x5   :  { %p2138_p3 = por %p2137_p2, %p2136_p1 }
   0x7   :  { %p2139_p4 = pnand %p2138_p3, %p2132_p0 }
   0x9   :  { %2142 = shalt.err (!%p2139_p4)
}
   0xa   :  { %s2146_s27 = smov 64   ;;  %s2147_s28 = smov 4  }
   0xb   :  { %26 = dma.hbm_to_vmem [thread:$0]  %s2347_s1, 14336, %s21_s25, [#allocation3], %s2146_s27, %s2146_s27, %s2147_s28  }
   0xc   :  { %2143 = dma.done.wait [#allocation3], 14336  }
   0xd   :  { %2144 = vsyncadd [#allocation3], 4294952960  ;;  %v1955_v0 = vld [vmem:[#allocation2 + $0x78] sm:$0xff]   ;;  %v1959_v4 = vld [vmem:[#allocation2 + $0x70] sm:$0xff]   ;;  %vm2149_vm0 = vmmov 0  }
   0xe   :  { %v1956_v1 = vld [vmem:[#allocation2 + $0x38] sm:$0xff]   ;;  %1745 = vmatprep.subr.bf16.mxu0 %v1955_v0  ;;  %v1960_v5 = vld [vmem:[#allocation2 + $0x30] sm:$0xff]   ;;  %v1963_v8 = vld [vmem:[#allocation2 + $0x68] sm:$0xff]  }
   0xf   :  { %v1957_v2 = vld [vmem:[#allocation2 + $0xf8] sm:$0xff]   ;;  %1746 = vmatpush3.bf16.msra.mxu0 %v1956_v1  ;;  %v1961_v6 = vld [vmem:[#allocation2 + $0xf0] sm:$0xff]   ;;  %v1964_v9 = vld [vmem:[#allocation2 + $0x28] sm:$0xff]  }
  0x10   :  { %v1958_v3 = vld [vmem:[#allocation2 + $0xb8] sm:$0xff]   ;;  %1767 = vmatprep.subr.bf16.mxu1 %v1957_v2  ;;  %1747 = vmatprep.subr.bf16.mxu0 %v1959_v4  ;;  %v1962_v7 = vld [vmem:[#allocation2 + $0xb0] sm:$0xff]   ;;  %v1965_v10 = vld [vmem:[#allocation2 + $0xe8] sm:$0xff]  }
  0x11   :  { %1768 = vmatpush3.bf16.msra.mxu1 %v1958_v3  ;;  %v1966_v11 = vld [vmem:[#allocation2 + $0xa8] sm:$0xff]   ;;  %v1967_v12 = vld [vmem:[#allocation2 + $0x60] sm:$0xff]   ;;  %v1971_v16 = vld [vmem:[#allocation2 + $0x58] sm:$0xff]  }
  0x12   :  { %1769 = vmatprep.subr.bf16.mxu1 %v1961_v6  ;;  %v1968_v13 = vld [vmem:[#allocation2 + $0x20] sm:$0xff]   ;;  %v1972_v17 = vld [vmem:[#allocation2 + $0x18] sm:$0xff]   ;;  %v1975_v20 = vld [vmem:[#allocation2 + $0x50] sm:$0xff]  }
  0x13   :  { %1748 = vmatpush3.bf16.msra.mxu0 %v1960_v5  ;;  %v1969_v14 = vld [vmem:[#allocation2 + $0xe0] sm:$0xff]   ;;  %v1973_v18 = vld [vmem:[#allocation2 + $0xd8] sm:$0xff]   ;;  %v1976_v21 = vld [vmem:[#allocation2 + $0x10] sm:$0xff]  }
  0x14   :  { %1749 = vmatprep.subr.bf16.mxu0 %v1963_v8  ;;  %v1970_v15 = vld [vmem:[#allocation2 + $0xa0] sm:$0xff]   ;;  %v1974_v19 = vld [vmem:[#allocation2 + $0x98] sm:$0xff]   ;;  %v1977_v22 = vld [vmem:[#allocation2 + $0xd0] sm:$0xff]  }
  0x15   :  { %1770 = vmatpush3.bf16.msra.mxu1 %v1962_v7  ;;  %v1978_v23 = vld [vmem:[#allocation2 + $0x90] sm:$0xff]   ;;  %v1979_v24 = vld [vmem:[#allocation2 + $0x48] sm:$0xff]   ;;  %v1983_v28 = vld [vmem:[#allocation2 + $0x40] sm:$0xff]  }
  0x16   :  { %1771 = vmatprep.subr.bf16.mxu1 %v1965_v10  ;;  %v1980_v25 = vld [vmem:[#allocation2 + $0x8] sm:$0xff]   ;;  %v1984_v29 = vld [vmem:[#allocation2] sm:$0xff]   ;;  %v1987_v37 = vld [vmem:[#allocation2 + $0x178] sm:$0xff]  }
  0x17   :  { %1750 = vmatpush3.bf16.msra.mxu0 %v1964_v9  ;;  %v1981_v26 = vld [vmem:[#allocation2 + $0xc8] sm:$0xff]   ;;  %v1985_v30 = vld [vmem:[#allocation2 + $0xc0] sm:$0xff]   ;;  %v2211_v38 = vld [vmem:[%s2346_s0 + $0x18] sm:$0xff] }
  0x18   :  { %1751 = vmatprep.subr.bf16.mxu0 %v1967_v12  ;;  %v1982_v27 = vld [vmem:[#allocation2 + $0x88] sm:$0xff]   ;;  %v1986_v33 = vld [vmem:[#allocation2 + $0x80] sm:$0xff]   ;;  %v100_v40 = vpack.c.bf16 %v2211_v38, %v2211_v38  ;;  %v1601_v41 = vmul.f32 -1.442695, %v2211_v38  ;;  %v1988_v42 = vld [vmem:[#allocation2 + $0x138] sm:$0xff]  }
  0x19   :  { %1772 = vmatpush3.bf16.msra.mxu1 %v1966_v11  ;;  %v2196_v31 = vld [vmem:[%s2346_s0 + $0x8] sm:$0xff]  ;;  %v2203_v34 = vld [vmem:[%s2346_s0] sm:$0xff]  ;;  %v2222_v43 = vld [vmem:[%s2346_s0 + $0x10] sm:$0xff] }
  0x1a   :  { %1773 = vmatprep.subr.bf16.mxu1 %v1969_v14  ;;  %v98_v32 = vpack.c.bf16 %v2196_v31, %v2196_v31  ;;  %v1598_v35 = vmul.f32 -1.442695, %v2203_v34  ;;  %v97_v36 = vpack.c.bf16 %v2203_v34, %v2203_v34  ;;  %v2214_v39 = vmul.f32 -1.442695, %v2196_v31  ;;  %1086 = vmatprep.mubr.bf16.mxu1 %v100_v40  ;;  %v1989_v46 = vld [vmem:[#allocation2 + $0x1f8] sm:$0xff]   ;;  %v1991_v48 = vld [vmem:[#allocation2 + $0x170] sm:$0xff]  }
  0x1b   :  { %1752 = vmatpush3.bf16.msra.mxu0 %v1968_v13  ;;  %v1600_v44 = vmul.f32 -1.442695, %v2222_v43  ;;  %v99_v45 = vpack.c.bf16 %v2222_v43, %v2222_v43  ;;  %v1990_v47 = vld [vmem:[#allocation2 + $0x1b8] sm:$0xff]   ;;  %v1992_v49 = vld [vmem:[#allocation2 + $0x130] sm:$0xff]   ;;  %v1995_v52 = vld [vmem:[#allocation2 + $0x168] sm:$0xff]  }
  0x1c   :  { %1753 = vmatprep.subr.bf16.mxu0 %v1971_v16  ;;  %1046 = vmatprep.mubr.bf16.mxu0 %v98_v32  ;;  %2091 = vpow2.f32 %v1598_v35  ;;  %v1993_v50 = vld [vmem:[#allocation2 + $0x1f0] sm:$0xff]   ;;  %v1996_v53 = vld [vmem:[#allocation2 + $0x128] sm:$0xff]   ;;  %v1999_v56 = vld [vmem:[#allocation2 + $0x160] sm:$0xff]  }
  0x1d   :  { %1774 = vmatpush3.bf16.msra.mxu1 %v1970_v15  ;;  %2093 = vpow2.f32 %v1600_v44  ;;  %v1994_v51 = vld [vmem:[#allocation2 + $0x1b0] sm:$0xff]   ;;  %v1997_v54 = vld [vmem:[#allocation2 + $0x1e8] sm:$0xff]   ;;  %v2000_v57 = vld [vmem:[#allocation2 + $0x120] sm:$0xff]  }
  0x1e   :  { %1775 = vmatprep.subr.bf16.mxu1 %v1973_v18  ;;  %v1998_v55 = vld [vmem:[#allocation2 + $0x1a8] sm:$0xff]   ;;  %v2001_v59 = vld [vmem:[#allocation2 + $0x1e0] sm:$0xff]   ;;  %v2003_v62 = vld [vmem:[#allocation2 + $0x158] sm:$0xff]  }
  0x1f   :  { %1754 = vmatpush3.bf16.msra.mxu0 %v1972_v17  ;;  %v2002_v61 = vld [vmem:[#allocation2 + $0x1a0] sm:$0xff]   ;;  %v2004_v0 = vld [vmem:[#allocation2 + $0x118] sm:$0xff]   ;;  %v2007_v4 = vld [vmem:[#allocation2 + $0x150] sm:$0xff]  }
  0x20   :  { %1755 = vmatprep.subr.bf16.mxu0 %v1975_v20  ;;  %v2005_v2 = vld [vmem:[#allocation2 + $0x1d8] sm:$0xff]   ;;  %v2008_v5 = vld [vmem:[#allocation2 + $0x110] sm:$0xff]   ;;  %v2011_v8 = vld [vmem:[#allocation2 + $0x148] sm:$0xff]  }
  0x21   :  { %1776 = vmatpush3.bf16.msra.mxu1 %v1974_v19  ;;  %v2006_v3 = vld [vmem:[#allocation2 + $0x198] sm:$0xff]   ;;  %v2009_v6 = vld [vmem:[#allocation2 + $0x1d0] sm:$0xff]   ;;  %v2012_v9 = vld [vmem:[#allocation2 + $0x108] sm:$0xff]  }
  0x22   :  { %1777 = vmatprep.subr.bf16.mxu1 %v1977_v22  ;;  %v2010_v7 = vld [vmem:[#allocation2 + $0x190] sm:$0xff]   ;;  %v2013_v10 = vld [vmem:[#allocation2 + $0x1c8] sm:$0xff]   ;;  %v2015_v12 = vld [vmem:[#allocation2 + $0x140] sm:$0xff]  }
  0x23   :  { %1756 = vmatpush3.bf16.msra.mxu0 %v1976_v21  ;;  %v2014_v11 = vld [vmem:[#allocation2 + $0x188] sm:$0xff]   ;;  %v2016_v13 = vld [vmem:[#allocation2 + $0x100] sm:$0xff]   ;;  %v2024_v40 = vld [vmem:[#allocation2 + $0x230] sm:$0xff]  }
  0x24   :  { %1757 = vmatprep.subr.bf16.mxu0 %v1979_v24  ;;  %v2017_v15 = vld [vmem:[#allocation2 + $0x1c0] sm:$0xff]   ;;  %v2231_v16 = vld [vmem:[%s2346_s0 + $0x28] sm:$0xff] }
  0x25   :  { %1778 = vmatpush3.bf16.msra.mxu1 %v1978_v23  ;;  %v102_v17 = vpack.c.bf16 %v2231_v16, %v2231_v16  ;;  %v2237_v19 = vmul.f32 -1.442695, %v2231_v16  ;;  %v2018_v20 = vld [vmem:[#allocation2 + $0x180] sm:$0xff]  }
  0x26   :  { %1779 = vmatprep.subr.bf16.mxu1 %v1981_v26  ;;  %v2242_v21 = vld [vmem:[%s2346_s0 + $0x20] sm:$0xff] }
  0x27   :  { %1758 = vmatpush3.bf16.msra.mxu0 %v1980_v25  ;;  %v1602_v23 = vmul.f32 -1.442695, %v2242_v21  ;;  %v101_v24 = vpack.c.bf16 %v2242_v21, %v2242_v21  ;;  %v2019_v25 = vld [vmem:[#allocation2 + $0x278] sm:$0xff]  }
  0x28   :  { %1759 = vmatprep.subr.bf16.mxu0 %v1983_v28  ;;  %v2250_v28 = vld [vmem:[%s2346_s0 + $0x30] sm:$0xff] }
  0x29   :  { %1780 = vmatpush3.bf16.msra.mxu1 %v1982_v27  ;;  %v2092_v58 = vpop.eup %2091  ;;  %v2020_v27 = vld [vmem:[#allocation2 + $0x238] sm:$0xff]   ;;  %v103_v32 = vpack.c.bf16 %v2250_v28, %v2250_v28 }
  0x2a   :  { %1781 = vmatprep.subr.bf16.mxu1 %v1985_v30  ;;  %v69_v60 = vadd.f32 1.0, %v2092_v58  ;;  %v2094_v63 = vpop.eup %2093  ;;  %v1604_v30 = vmul.f32 -1.442695, %v2250_v28  ;;  %v2036_v58 = vld [vmem:[#allocation2 + $0x218] sm:$0xff]  }
  0x2b   :  { %1760 = vmatpush3.bf16.msra.mxu0 %v1984_v29  ;;  %v71_v1 = vadd.f32 1.0, %v2094_v63  ;;  %v2041_v63 = vld [vmem:[#allocation2 + $0x2d0] sm:$0xff]  }
  0x2c   :  { %1789 = vmatprep.subr.bf16.mxu0 %v1987_v37  ;;  %2095 = vrcp.f32 %v69_v60  ;;  %v2023_v37 = vld [vmem:[#allocation2 + $0x270] sm:$0xff]   ;;  %v2038_v60 = vld [vmem:[#allocation2 + $0x298] sm:$0xff]  }
  0x2d   :  { %1782 = vmatpush3.bf16.msra.mxu1 %v1986_v33  ;;  %2097 = vrcp.f32 %v71_v1  ;;  %v2021_v33 = vld [vmem:[#allocation2 + $0x2f8] sm:$0xff]   ;;  %v2042_v1 = vld [vmem:[#allocation2 + $0x290] sm:$0xff]  }
  0x2e   :  { %1047 = vmatmul.mubr.bf16.vlgmr.msra.gmra.mxu0 %v97_v36  ;;  %1811 = vmatprep.subr.bf16.mxu1 %v1989_v46  ;;  %2099 = vpow2.f32 %v2214_v39  ;;  %v2022_v36 = vld [vmem:[#allocation2 + $0x2b8] sm:$0xff]   ;;  %v2028_v46 = vld [vmem:[#allocation2 + $0x228] sm:$0xff]  }
  0x2f   :  { %1790 = vmatpush3.bf16.msra.mxu0 %v1988_v42  ;;  %2101 = vpow2.f32 %v1601_v41  ;;  %1126 = vmatprep.mubr.bf16.mxu0 %v102_v17  ;;  %v2025_v42 = vld [vmem:[#allocation2 + $0x2f0] sm:$0xff]  }
  0x30   :  { %1087 = vmatmul.mubr.bf16.vlgmr.msra.gmra.mxu1 %v99_v45  ;;  %1791 = vmatprep.subr.bf16.mxu0 %v1991_v48  ;;  %2103 = vpow2.f32 %v1602_v23  ;;  %v2027_v45 = vld [vmem:[#allocation2 + $0x268] sm:$0xff]  }
  0x31   :  { %1812 = vmatpush3.bf16.msra.mxu1 %v1990_v47  ;;  %2105 = vpow2.f32 %v1604_v30  ;;  %v2029_v47 = vld [vmem:[#allocation2 + $0x2e8] sm:$0xff]   ;;  %v2059_v30 = vld [vmem:[#allocation2 + $0x358] sm:$0xff]  }
  0x32   :  { %1813 = vmatprep.subr.bf16.mxu1 %v1993_v50  ;;  %v2030_v48 = vld [vmem:[#allocation2 + $0x2a8] sm:$0xff]   ;;  %v2032_v50 = vld [vmem:[#allocation2 + $0x220] sm:$0xff]  }
  0x33   :  { %1792 = vmatpush3.bf16.msra.mxu0 %v1992_v49  ;;  %v2031_v49 = vld [vmem:[#allocation2 + $0x260] sm:$0xff]  }
  0x34   :  { %1793 = vmatprep.subr.bf16.mxu0 %v1995_v52  ;;  %v2033_v52 = vld [vmem:[#allocation2 + $0x2e0] sm:$0xff]  }
  0x35   :  { %1814 = vmatpush3.bf16.msra.mxu1 %v1994_v51 }
  0x36   :  { %1815 = vmatprep.subr.bf16.mxu1 %v1997_v54  ;;  %v2034_v54 = vld [vmem:[#allocation2 + $0x2a0] sm:$0xff]  }
  0x37   :  { %1794 = vmatpush3.bf16.msra.mxu0 %v1996_v53 }
  0x38   :  { %1795 = vmatprep.subr.bf16.mxu0 %v1999_v56  ;;  %v2035_v56 = vld [vmem:[#allocation2 + $0x258] sm:$0xff]  }
  0x39   :  { %1816 = vmatpush3.bf16.msra.mxu1 %v1998_v55  ;;  %v2096_v14 = vpop.eup %2095 }
  0x3a   :  { %1817 = vmatprep.subr.bf16.mxu1 %v2001_v59  ;;  %v90_v18 = vmul.f32 %v2096_v14, %v2203_v34  ;;  %v2098_v22 = vpop.eup %2097  ;;  %v2037_v59 = vld [vmem:[#allocation2 + $0x2d8] sm:$0xff]   ;;  %v2050_v14 = vld [vmem:[#allocation2 + $0x280] sm:$0xff]  }
  0x3b   :  { %1796 = vmatpush3.bf16.msra.mxu0 %v2000_v57  ;;  %v92_v29 = vmul.f32 %v2098_v22, %v2222_v43  ;;  %v2100_v35 = vpop.eup %2099  ;;  %v2026_v43 = vld [vmem:[#allocation2 + $0x2b0] sm:$0xff]  }
  0x3c   :  { %1797 = vmatprep.subr.bf16.mxu0 %v2003_v62  ;;  %v104_v26 = vpack.c.bf16 %v90_v18, %v90_v18  ;;  %v2102_v39 = vpop.eup %2101  ;;  %v70_v41 = vadd.f32 1.0, %v2100_v35  ;;  %v2040_v62 = vld [vmem:[#allocation2 + $0x210] sm:$0xff]   ;;  %v2051_v18 = vld [vmem:[#allocation2 + $0x378] sm:$0xff]   ;;  %v2063_v35 = vld [vmem:[#allocation2 + $0x348] sm:$0xff]  }
  0x3d   :  { %1818 = vmatpush3.bf16.msra.mxu1 %v2002_v61  ;;  %v106_v34 = vpack.c.bf16 %v92_v29, %v92_v29  ;;  %v72_v44 = vadd.f32 1.0, %v2102_v39  ;;  %v2104_v51 = vpop.eup %2103  ;;  %v2039_v61 = vld [vmem:[#allocation2 + $0x250] sm:$0xff]   ;;  %v2057_v29 = vld [vmem:[#allocation2 + $0x360] sm:$0xff]  }
  0x3e   :  { %1819 = vmatprep.subr.bf16.mxu1 %v2005_v2  ;;  %1166 = vmatprep.mubr.bf16.mxu1 %v104_v26  ;;  %2107 = vrcp.f32 %v70_v41  ;;  %v73_v53 = vadd.f32 1.0, %v2104_v51  ;;  %v2106_v55 = vpop.eup %2105  ;;  %v2043_v2 = vld [vmem:[#allocation2 + $0x248] sm:$0xff]   ;;  %v2053_v22 = vld [vmem:[#allocation2 + $0x370] sm:$0xff]  }
  0x3f   :  { %1798 = vmatpush3.bf16.msra.mxu0 %v2004_v0  ;;  %2109 = vrcp.f32 %v72_v44  ;;  %v75_v57 = vadd.f32 1.0, %v2106_v55  ;;  %v2148_v44 = vmov 0.0  }
  0x40   :  { %1799 = vmatprep.subr.bf16.mxu0 %v2007_v4  ;;  %2111 = vrcp.f32 %v73_v53  ;;  %v2044_v4 = vld [vmem:[#allocation2 + $0x208] sm:$0xff]  }
  0x41   :  { %1820 = vmatpush3.bf16.msra.mxu1 %v2006_v3  ;;  %2113 = vrcp.f32 %v75_v57 }
  0x42   :  { %1821 = vmatprep.subr.bf16.mxu1 %v2009_v6  ;;  %2115 = vpow2.f32 %v2237_v19  ;;  %v2045_v6 = vld [vmem:[#allocation2 + $0x2c8] sm:$0xff]  }
  0x43   :  { %1800 = vmatpush3.bf16.msra.mxu0 %v2008_v5 }
  0x44   :  { %1801 = vmatprep.subr.bf16.mxu0 %v2011_v8 }
  0x45   :  { %1822 = vmatpush3.bf16.msra.mxu1 %v2010_v7  ;;  %v2046_v7 = vld [vmem:[#allocation2 + $0x288] sm:$0xff]  }
  0x46   :  { %1823 = vmatprep.subr.bf16.mxu1 %v2013_v10  ;;  %v2048_v10 = vld [vmem:[#allocation2 + $0x200] sm:$0xff]  }
  0x47   :  { %1802 = vmatpush3.bf16.msra.mxu0 %v2012_v9  ;;  %v2047_v9 = vld [vmem:[#allocation2 + $0x240] sm:$0xff]  }
  0x48   :  { %1803 = vmatprep.subr.bf16.mxu0 %v2015_v12 }
  0x49   :  { %1824 = vmatpush3.bf16.msra.mxu1 %v2014_v11 }
  0x4a   :  { %1825 = vmatprep.subr.bf16.mxu1 %v2017_v15 }
  0x4b   :  { %1804 = vmatpush3.bf16.msra.mxu0 %v2016_v13  ;;  %v2108_v0 = vpop.eup %2107  ;;  %v2049_v13 = vld [vmem:[#allocation2 + $0x2c0] sm:$0xff]  }
  0x4c   :  { %1833 = vmatprep.subr.bf16.mxu0 %v2019_v25  ;;  %v2110_v3 = vpop.eup %2109  ;;  %v91_v5 = vmul.f32 %v2108_v0, %v2196_v31 }
  0x4d   :  { %1826 = vmatpush3.bf16.msra.mxu1 %v2018_v20  ;;  %v93_v8 = vmul.f32 %v2110_v3, %v2211_v38  ;;  %v2112_v11 = vpop.eup %2111  ;;  %v2052_v20 = vld [vmem:[#allocation2 + $0x338] sm:$0xff]  }
  0x4e   :  { %1127 = vmatmul.mubr.bf16.vlgmr.msra.gmra.mxu0 %v101_v24  ;;  %1855 = vmatprep.subr.bf16.mxu1 %v2021_v33  ;;  %v105_v12 = vpack.c.bf16 %v91_v5, %v91_v5  ;;  %v94_v15 = vmul.f32 %v2112_v11, %v2242_v21  ;;  %v2114_v17 = vpop.eup %2113  ;;  %v2054_v24 = vld [vmem:[#allocation2 + $0x330] sm:$0xff]   ;;  %v2055_v21 = vld [vmem:[#allocation2 + $0x368] sm:$0xff]  }
  0x4f   :  { %1834 = vmatpush3.bf16.msra.mxu0 %v2020_v27  ;;  %1206 = vmatprep.mubr.bf16.mxu0 %v106_v34  ;;  %v107_v31 = vpack.c.bf16 %v93_v8, %v93_v8  ;;  %v96_v38 = vmul.f32 %v2114_v17, %v2250_v28  ;;  %v2116_v23 = vpop.eup %2115  ;;  %v2056_v27 = vld [vmem:[#allocation2 + $0x328] sm:$0xff]   ;;  %v2058_v28 = vld [vmem:[#allocation2 + $0x320] sm:$0xff]   ;;  %v2061_v33 = vld [vmem:[#allocation2 + $0x350] sm:$0xff]  }
  0x50   :  { %1167 = vmatmul.mubr.bf16.vlgmr.msra.gmra.mxu1 %v103_v32  ;;  %1835 = vmatprep.subr.bf16.mxu0 %v2023_v37  ;;  %v108_v19 = vpack.c.bf16 %v94_v15, %v94_v15  ;;  %v74_v26 = vadd.f32 1.0, %v2116_v23  ;;  %v2060_v32 = vld [vmem:[#allocation2 + $0x318] sm:$0xff]   ;;  %v2062_v34 = vld [vmem:[#allocation2 + $0x310] sm:$0xff]   ;;  %v2065_v37 = vld [vmem:[#allocation2 + $0x340] sm:$0xff]  }
  0x51   :  { %1856 = vmatpush3.bf16.msra.mxu1 %v2022_v36  ;;  %v110_v25 = vpack.c.bf16 %v96_v38, %v96_v38  ;;  %v2064_v36 = vld [vmem:[#allocation2 + $0x308] sm:$0xff]  }
  0x52   :  { %1857 = vmatprep.subr.bf16.mxu1 %v2025_v42  ;;  %1246 = vmatprep.mubr.bf16.mxu1 %v108_v19  ;;  %2117 = vrcp.f32 %v74_v26 }
  0x53   :  { %1836 = vmatpush3.bf16.msra.mxu0 %v2024_v40  ;;  %v2066_v40 = vld [vmem:[#allocation2 + $0x300] sm:$0xff]  }
  0x54   :  { %1837 = vmatprep.subr.bf16.mxu0 %v2027_v45  ;;  %v2068_v45 = vld [vmem:[%s2349_s3 + $0x30] sm:$0xff]  }
  0x55   :  { %1858 = vmatpush3.bf16.msra.mxu1 %v2026_v43  ;;  %v2067_v43 = vld [vmem:[%s2349_s3 + $0x38] sm:$0xff]  }
  0x56   :  { %1859 = vmatprep.subr.bf16.mxu1 %v2029_v47  ;;  %v2071_v47 = vld [vmem:[%s2349_s3 + $0x18] sm:$0xff]  }
  0x57   :  { %1838 = vmatpush3.bf16.msra.mxu0 %v2028_v46  ;;  %v2070_v46 = vld [vmem:[%s2349_s3 + $0x20] sm:$0xff]  }
  0x58   :  { %1839 = vmatprep.subr.bf16.mxu0 %v2031_v49  ;;  %v2073_v49 = vld [vmem:[%s2349_s3 + $0x8] sm:$0xff]  }
  0x59   :  { %1860 = vmatpush3.bf16.msra.mxu1 %v2030_v48  ;;  %v2072_v48 = vld [vmem:[%s2349_s3 + $0x10] sm:$0xff]  }
  0x5a   :  { %1861 = vmatprep.subr.bf16.mxu1 %v2033_v52  ;;  %v1605_v52 = vld [vmem:[%s2348_s2] ss:$0 sm:$0xff] }
  0x5b   :  { %1840 = vmatpush3.bf16.msra.mxu0 %v2032_v50  ;;  %v2074_v50 = vld [vmem:[%s2349_s3] sm:$0xff]  }
  0x5c   :  { %1841 = vmatprep.subr.bf16.mxu0 %v2035_v56 }
  0x5d   :  { %1862 = vmatpush3.bf16.msra.mxu1 %v2034_v54 }
  0x5e   :  { %1863 = vmatprep.subr.bf16.mxu1 %v2037_v59 }
  0x5f   :  { %1842 = vmatpush3.bf16.msra.mxu0 %v2036_v58  ;;  %v2118_v39 = vpop.eup %2117 }
  0x60   :  { %1843 = vmatprep.subr.bf16.mxu0 %v2039_v61  ;;  %v95_v41 = vmul.f32 %v2118_v39, %v2231_v16  ;;  %v2069_v16 = vld [vmem:[%s2349_s3 + $0x28] sm:$0xff]   ;;  %v2081_v39 = vld [vmem:[%s2351_s5 + $0x60] sm:$0xff]  }
  0x61   :  { %1864 = vmatpush3.bf16.msra.mxu1 %v2038_v60 }
  0x62   :  { %1865 = vmatprep.subr.bf16.mxu1 %v2041_v63  ;;  %v109_v42 = vpack.c.bf16 %v95_v41, %v95_v41  ;;  %v2083_v41 = vld [vmem:[%s2351_s5 + $0x58] sm:$0xff]  }
  0x63   :  { %1844 = vmatpush3.bf16.msra.mxu0 %v2040_v62 }
  0x64   :  { %1845 = vmatprep.subr.bf16.mxu0 %v2043_v2 }
  0x65   :  { %1866 = vmatpush3.bf16.msra.mxu1 %v2042_v1 }
  0x66   :  { %1867 = vmatprep.subr.bf16.mxu1 %v2045_v6 }
  0x67   :  { %1846 = vmatpush3.bf16.msra.mxu0 %v2044_v4 }
  0x68   :  { %1847 = vmatprep.subr.bf16.mxu0 %v2047_v9 }
  0x69   :  { %1868 = vmatpush3.bf16.msra.mxu1 %v2046_v7 }
  0x6a   :  { %1869 = vmatprep.subr.bf16.mxu1 %v2049_v13 }
  0x6b   :  { %1848 = vmatpush3.bf16.msra.mxu0 %v2048_v10 }
  0x6c   :  { %1877 = vmatprep.subr.bf16.mxu0 %v2051_v18 }
  0x6d   :  { %1870 = vmatpush3.bf16.msra.mxu1 %v2050_v14 }
  0x6e   :  { %1207 = vmatmul.mubr.bf16.vlgmr.msra.gmra.mxu0 %v105_v12  ;;  %1930 = vmatprep.subr.bf16.mxu1 %v2148_v44 }
  0x6f   :  { %1878 = vmatpush3.bf16.msra.mxu0 %v2052_v20  ;;  %1286 = vmatprep.mubr.bf16.mxu0 %v110_v25 }
  0x70   :  { %1247 = vmatmul.mubr.bf16.vlgmr.msra.gmra.mxu1 %v107_v31  ;;  %1879 = vmatprep.subr.bf16.mxu0 %v2053_v22 }
  0x71   :  { %1931 = vmatpush3.bf16.msra.mxu1 %v2067_v43  ;;  %1946 = vmatprep.mubr.msk.bf16.mxu1 %vm2149_vm0, %v2148_v44  ;;  %v2085_v43 = vld [vmem:[%s2351_s5 + $0x50] sm:$0xff]  }
  0x72   :  { %1932 = vmatprep.subr.bf16.mxu1 %v2148_v44 }
  0x73   :  { %1880 = vmatpush3.bf16.msra.mxu0 %v2054_v24 }
  0x74   :  { %1881 = vmatprep.subr.bf16.mxu0 %v2055_v21 }
  0x75   :  { %1933 = vmatpush3.bf16.msra.mxu1 %v2068_v45  ;;  %v2087_v45 = vld [vmem:[%s2351_s5 + $0x48] sm:$0xff]  }
  0x76   :  { %1934 = vmatprep.subr.bf16.mxu1 %v2148_v44 }
  0x77   :  { %1882 = vmatpush3.bf16.msra.mxu0 %v2056_v27 }
  0x78   :  { %1883 = vmatprep.subr.bf16.mxu0 %v2057_v29 }
  0x79   :  { %1935 = vmatpush3.bf16.msra.mxu1 %v2069_v16  ;;  %v2088_v16 = vld [vmem:[%s2351_s5 + $0x8] sm:$0xff]  }
  0x7a   :  { %1936 = vmatprep.subr.bf16.mxu1 %v2148_v44 }
  0x7b   :  { %1884 = vmatpush3.bf16.msra.mxu0 %v2058_v28 }
  0x7c   :  { %1885 = vmatprep.subr.bf16.mxu0 %v2059_v30 }
  0x7d   :  { %1937 = vmatpush3.bf16.msra.mxu1 %v2070_v46  ;;  %v2089_v46 = vld [vmem:[%s2351_s5 + $0x40] sm:$0xff]  }
  0x7e   :  { %1938 = vmatprep.subr.bf16.mxu1 %v2148_v44 }
  0x7f   :  { %1886 = vmatpush3.bf16.msra.mxu0 %v2060_v32  ;;  %v2075_v32 = vld [vmem:[%s2351_s5 + $0x78] sm:$0xff]  }
  0x80   :  { %1887 = vmatprep.subr.bf16.mxu0 %v2061_v33  ;;  %v2076_v33 = vld [vmem:[%s2351_s5 + $0x38] sm:$0xff]  }
  0x81   :  { %1939 = vmatpush3.bf16.msra.mxu1 %v2071_v47  ;;  %v2090_v47 = vld [vmem:[%s2351_s5] sm:$0xff]  }
  0x82   :  { %1940 = vmatprep.subr.bf16.mxu1 %v2148_v44 }
  0x83   :  { %1888 = vmatpush3.bf16.msra.mxu0 %v2062_v34  ;;  %v2077_v34 = vld [vmem:[%s2351_s5 + $0x70] sm:$0xff]  }
  0x84   :  { %1889 = vmatprep.subr.bf16.mxu0 %v2063_v35  ;;  %v2078_v35 = vld [vmem:[%s2351_s5 + $0x30] sm:$0xff]  }
  0x85   :  { %1941 = vmatpush3.bf16.msra.mxu1 %v2072_v48  ;;  %v1718_v48 = vld [vmem:[%s2350_s4] ss:$0 sm:$0xff] }
  0x86   :  { %1942 = vmatprep.subr.bf16.mxu1 %v2148_v44 }
  0x87   :  { %1890 = vmatpush3.bf16.msra.mxu0 %v2064_v36  ;;  %v2079_v36 = vld [vmem:[%s2351_s5 + $0x68] sm:$0xff]  }
  0x88   :  { %1891 = vmatprep.subr.bf16.mxu0 %v2065_v37  ;;  %v2080_v37 = vld [vmem:[%s2351_s5 + $0x28] sm:$0xff]  }
  0x89   :  { %1943 = vmatpush3.bf16.msra.mxu1 %v2073_v49 }
  0x8a   :  { %1944 = vmatprep.subr.bf16.mxu1 %v2148_v44  ;;  %v2086_v44 = vld [vmem:[%s2351_s5 + $0x10] sm:$0xff]  }
  0x8b   :  { %1892 = vmatpush3.bf16.msra.mxu0 %v2066_v40  ;;  %v2082_v40 = vld [vmem:[%s2351_s5 + $0x20] sm:$0xff]  }
  0x8c   :  { %1908 = vmatprep.subr.bf16.mxu0 %v2075_v32 }
  0x8d   :  { %1945 = vmatpush3.bf16.msra.mxu1 %v2074_v50 }
  0x8e   :  { %1287 = vmatmul.mubr.bf16.vlgmr.msra.gmra.mxu0 %v109_v42  ;;  %v2084_v42 = vld [vmem:[%s2351_s5 + $0x18] sm:$0xff]  }
  0x8f   :  { %1909 = vmatpush3.bf16.msra.mxu0 %v2076_v33 }
  0x90   :  { %1910 = vmatprep.subr.bf16.mxu0 %v2077_v34 }
  0x93   :  { %1911 = vmatpush3.bf16.msra.mxu0 %v2078_v35 }
  0x94   :  { %1912 = vmatprep.subr.bf16.mxu0 %v2079_v36 }
  0x97   :  { %1913 = vmatpush3.bf16.msra.mxu0 %v2080_v37 }
  0x98   :  { %1914 = vmatprep.subr.bf16.mxu0 %v2081_v39 }
  0x9b   :  { %1915 = vmatpush3.bf16.msra.mxu0 %v2082_v40 }
  0x9c   :  { %1916 = vmatprep.subr.bf16.mxu0 %v2083_v41 }
  0x9f   :  { %1917 = vmatpush3.bf16.msra.mxu0 %v2084_v42 }
  0xa0   :  { %1918 = vmatprep.subr.bf16.mxu0 %v2085_v43 }
  0xa3   :  { %1919 = vmatpush3.bf16.msra.mxu0 %v2086_v44 }
  0xa4   :  { %1920 = vmatprep.subr.bf16.mxu0 %v2087_v45 }
  0xa7   :  { %1921 = vmatpush3.bf16.msra.mxu0 %v2088_v16 }
  0xa8   :  { %1922 = vmatprep.subr.bf16.mxu0 %v2089_v46 }
  0xab   :  { %1923 = vmatpush3.bf16.msra.mxu0 %v2090_v47 }
  0xee   :  { %v1761_v51 = vpop.f32.mrf.mxu0 }
  0xf0   :  { %v1762_v53 = vpop.f32.mrf.mxu0  ;;  %v1783_v55 = vpop.f32.mrf.mxu1 }
  0xf1   :  { %v1763_v54 = vadd.f32 %v1762_v53, %v1761_v51 }
  0xf2   :  { %v1764_v56 = vpop.f32.mrf.mxu0  ;;  %v1784_v58 = vpop.f32.mrf.mxu1 }
  0xf3   :  { %v1049_v57 = vadd.f32 %v1763_v54, %v1605_v52  ;;  %v1785_v59 = vadd.f32 %v1784_v58, %v1783_v55 }
  0xf4   :  { %v1765_v60 = vpop.f32.mrf.mxu0  ;;  %v1786_v61 = vpop.f32.mrf.mxu1 }
  0xf5   :  { %v1089_v62 = vadd.f32 %v1785_v59, %v1049_v57 }
  0xf6   :  { %v1787_v63 = vpop.f32.mrf.mxu1 }
  0xf7   :  { %v1728_v63 = vld [vmem:[%s2352_s6] ss:$0 sm:$0xff] }
 0x10e   :  { %v1805_v0 = vpop.f32.mrf.mxu0 }
 0x110   :  { %v1806_v1 = vpop.f32.mrf.mxu0  ;;  %v1827_v2 = vpop.f32.mrf.mxu1 }
 0x111   :  { %v1807_v17 = vadd.f32 %v1806_v1, %v1805_v0 }
 0x112   :  { %v1808_v3 = vpop.f32.mrf.mxu0  ;;  %v1828_v4 = vpop.f32.mrf.mxu1 }
 0x113   :  { %v1129_v31 = vadd.f32 %v1807_v17, %v1089_v62  ;;  %v1829_v18 = vadd.f32 %v1828_v4, %v1827_v2 }
 0x114   :  { %v1809_v5 = vpop.f32.mrf.mxu0  ;;  %v1830_v6 = vpop.f32.mrf.mxu1 }
 0x115   :  { %v1169_v20 = vadd.f32 %v1829_v18, %v1129_v31 }
 0x116   :  { %v1831_v7 = vpop.f32.mrf.mxu1 }
 0x12e   :  { %v1849_v8 = vpop.f32.mrf.mxu0 }
 0x130   :  { %v1850_v9 = vpop.f32.mrf.mxu0  ;;  %v1871_v10 = vpop.f32.mrf.mxu1 }
 0x131   :  { %v1851_v19 = vadd.f32 %v1850_v9, %v1849_v8 }
 0x132   :  { %v1852_v11 = vpop.f32.mrf.mxu0  ;;  %v1872_v12 = vpop.f32.mrf.mxu1 }
 0x133   :  { %v1209_v38 = vadd.f32 %v1851_v19, %v1169_v20  ;;  %v1873_v22 = vadd.f32 %v1872_v12, %v1871_v10 }
 0x134   :  { %v1853_v13 = vpop.f32.mrf.mxu0  ;;  %v1874_v14 = vpop.f32.mrf.mxu1 }
 0x135   :  { %v1249_v25 = vadd.f32 %v1873_v22, %v1209_v38 }
 0x136   :  { %v1875_v15 = vpop.f32.mrf.mxu1 }
 0x14e   :  { %v1893_v23 = vpop.f32.mrf.mxu0 }
 0x150   :  { %v1894_v24 = vpop.f32.mrf.mxu0 }
 0x151   :  { %v1895_v21 = vadd.f32 %v1894_v24, %v1893_v23 }
 0x152   :  { %v1896_v26 = vpop.f32.mrf.mxu0 }
 0x153   :  { %v1289_v27 = vadd.f32 %v1895_v21, %v1249_v25 }
 0x154   :  { %v1897_v29 = vpop.f32.mrf.mxu0 }
 0x155   :  { %v1294_v28 = vmax.f32 %v1289_v27, 0.0 }
 0x157   :  { %v1295_v30 = vpack.c.bf16 %v1294_v28, %v1294_v28 }
 0x159   :  { %1947 = vmatmul.mubr.bf16.vlgmr.msra.gmra.mxu1 %v1295_v30 }
 0x219   :  { %v1401_v49 = vpop.f32.mrf.mxu1 }
 0x21a   :  { %v1402_v50 = vadd.f32 %v1718_v48, %v1401_v49 }
 0x21b   :  { %v1948_v51 = vpop.f32.mrf.mxu1 }
 0x21c   :  { %v1407_v52 = vmax.f32 %v1402_v50, 0.0 }
 0x21d   :  { %v1404_v53 = vpop.f32.mrf.mxu1 }
 0x21e   :  { %v1727_v54 = vmul.f32 -1.442695, %v1407_v52  ;;  %v1415_v61 = vpack.c.bf16 %v1407_v52, %v1407_v52 }
 0x21f   :  { %v1949_v55 = vpop.f32.mrf.mxu1 }
 0x220   :  { %2119 = vpow2.f32 %v1727_v54 }
 0x22d   :  { %v2120_v56 = vpop.eup %2119 }
 0x22e   :  { %v1411_v57 = vadd.f32 1.0, %v2120_v56 }
 0x230   :  { %2121 = vrcp.f32 %v1411_v57 }
 0x23d   :  { %v2122_v58 = vpop.eup %2121 }
 0x23e   :  { %v1414_v59 = vmul.f32 %v2122_v58, %v1407_v52 }
 0x240   :  { %v1416_v60 = vpack.c.bf16 %v1414_v59, %v1414_v59 }
 0x242   :  { %1584 = vmatprep.mubr.bf16.mxu0 %v1416_v60 }
 0x243   :  { %1585 = vmatmul.mubr.bf16.vlgmr.msra.gmra.mxu0 %v1415_v61 }
 0x303   :  { %v1924_v62 = vpop.f32.mrf.mxu0 }
 0x305   :  { %v1925_v0 = vpop.f32.mrf.mxu0 }
 0x306   :  { %v1926_v1 = vadd.f32 %v1925_v0, %v1924_v62 }
 0x307   :  { %v1927_v2 = vpop.f32.mrf.mxu0 }
 0x308   :  { %v1587_v3 = vadd.f32 %v1926_v1, %v1728_v63 }
 0x309   :  { %v1928_v4 = vpop.f32.mrf.mxu0 }
 0x30a   :  { %1592 = vst [vmem:[%s2353_s7] sm:$0xff] %v1587_v3 }
 0x30b   :  { %1597 = vsyncpa [#allocation3], 1 }

</bundles_post_ra>
